<compile_context>
chip_gen: v7x
topology: tpu7x:2x2x1
jax: 0.10.0
libtpu: 0.0.40
codegen_flags: <defaults>
</compile_context>

<pallas_src>
import functools

import jax
import jax.numpy as jnp
from jax.experimental import pallas as pl
from jax.experimental.pallas import tpu as pltpu


def _round_up(n, m):
    return ((n + m - 1) // m) * m


def mlp_kernel(x_ref, w1_ref, b1_ref, w2_ref, b2_ref, out_ref):
    # fc1: cast x to bf16 in VMEM (no extra HBM pass), bf16 MXU operands, f32 accumulation.
    x = x_ref[...].astype(jnp.bfloat16)                              # (TB, K)
    h = jnp.dot(x, w1_ref[...], preferred_element_type=jnp.float32)  # (TB, H) f32
    # Bias add + ReLU in f32 (v5e has no bf16 VPU; this is free under the DMA shadow anyway).
    h = jnp.maximum(h + b1_ref[...], 0.0)
    # fc2: cast activations to bf16 only as MXU operands, accumulate in f32.
    o = jnp.dot(h.astype(jnp.bfloat16), w2_ref[...],
                preferred_element_type=jnp.float32)                  # (TB, Np) f32
    out_ref[...] = (o + b2_ref[...]).astype(out_ref.dtype)


def prepare_params(w1, b1, w2, b2):
    """One-time weight prep (hoisted out of the per-call path).

    Casts weights to bf16 and pads the output-feature dim of fc2 to 8 columns so the
    kernel's output block is a cheap (TB, 8) f32 store instead of a 128-lane padded one.
    """
    K, H = w1.shape
    N = w2.shape[1]
    Np = max(_round_up(N, 8), 8)
    w1p = w1.astype(jnp.bfloat16)                                             # (K, H)
    b1p = b1.reshape(1, H).astype(jnp.float32)                                # (1, H)
    w2p = jnp.zeros((H, Np), jnp.bfloat16).at[:, :N].set(w2.astype(jnp.bfloat16))
    b2p = jnp.zeros((1, Np), jnp.float32).at[:, :N].set(
        b2.reshape(1, N).astype(jnp.float32))
    return w1p, b1p, w2p, b2p


def _choose_batch_tile(B, block_b):
    """Batch tile: single step for small B; >=2 steps for moderate B (v7x megacore);
    cap at block_b (multiple of 16) for large B."""
    if B <= 1024:
        return B                                  # == full dim -> always a legal block
    if B <= block_b:
        return _round_up(pl.cdiv(B, 2), 16)       # >= 2 grid steps, 16-row granularity
    return block_b


@functools.partial(jax.jit, static_argnames=("num_classes", "block_b"))
def neural_network_forward(x, w1p, b1p, w2p, b2p, *, num_classes, block_b=4096):
    """Linear -> ReLU -> Linear as a single batch-tiled Pallas kernel."""
    B, K = x.shape
    Kw, H = w1p.shape
    assert Kw == K
    Np = w2p.shape[1]

    TB = _choose_batch_tile(B, block_b)
    grid = (pl.cdiv(B, TB),)                      # partial last block handled by masking

    out = pl.pallas_call(
        mlp_kernel,
        out_shape=jax.ShapeDtypeStruct((B, Np), jnp.float32),
        grid_spec=pltpu.PrefetchScalarGridSpec(
            num_scalar_prefetch=0,
            grid=grid,
            in_specs=[
                pl.BlockSpec((TB, K), lambda i: (i, 0)),    # x: pipelined per batch tile
                pl.BlockSpec((K, H), lambda i: (0, 0)),     # W1: VMEM-resident
                pl.BlockSpec((1, H), lambda i: (0, 0)),     # b1: VMEM-resident
                pl.BlockSpec((H, Np), lambda i: (0, 0)),    # W2: VMEM-resident
                pl.BlockSpec((1, Np), lambda i: (0, 0)),    # b2: VMEM-resident
            ],
            out_specs=pl.BlockSpec((TB, Np), lambda i: (i, 0)),
        ),
        compiler_params=pltpu.CompilerParams(
            dimension_semantics=("parallel",),    # lets v7x shard batch tiles over 2 TCs
        ),
    )(x, w1p, b1p, w2p, b2p)

    return out[:, :num_classes]


def init_params(key, input_size=20, hidden_size=128, num_classes=5):
    # Deterministic init mimicking PyTorch nn.Linear default (uniform +-1/sqrt(fan_in)).
    k1, k2, k3, k4 = jax.random.split(key, 4)
    bound1 = 1.0 / jnp.sqrt(input_size)
    bound2 = 1.0 / jnp.sqrt(hidden_size)
    w1 = jax.random.uniform(k1, (input_size, hidden_size), jnp.float32, -bound1, bound1)
    b1 = jax.random.uniform(k2, (1, hidden_size), jnp.float32, -bound1, bound1)
    w2 = jax.random.uniform(k3, (hidden_size, num_classes), jnp.float32, -bound2, bound2)
    b2 = jax.random.uniform(k4, (1, num_classes), jnp.float32, -bound2, bound2)
    return w1, b1, w2, b2


def reference_forward_bf16(x, w1, b1, w2, b2):
    # Mirrors the kernel's math exactly (bf16 MXU operands, f32 accumulation).
    h = jnp.dot(x.astype(jnp.bfloat16), w1.astype(jnp.bfloat16),
                preferred_element_type=jnp.float32) + b1.reshape(1, -1)
    h = jnp.maximum(h, 0.0)
    return jnp.dot(h.astype(jnp.bfloat16), w2.astype(jnp.bfloat16),
                   preferred_element_type=jnp.float32) + b2.reshape(1, -1)


def reference_forward_f32(x, w1, b1, w2, b2):
    # Plain f32 reference matching PyTorch semantics (loose sanity check only).
    h = jnp.maximum(x @ w1 + b1.reshape(1, -1), 0.0)
    return h @ w2 + b2.reshape(1, -1)


if __name__ == "__main__":
    key = jax.random.PRNGKey(0)
    kx, kp = jax.random.split(key)

    B, INPUT, HIDDEN, CLASSES = 8, 20, 128, 5
    x = jax.random.normal(kx, (B, INPUT), jnp.float32)
    w1, b1, w2, b2 = init_params(kp, INPUT, HIDDEN, CLASSES)

    # One-time weight prep, then run the kernel.
    w1p, b1p, w2p, b2p = prepare_params(w1, b1, w2, b2)
    out = neural_network_forward(x, w1p, b1p, w2p, b2p, num_classes=CLASSES)
    out = jax.block_until_ready(out)
    assert out.shape == (B, CLASSES)

    # Tight check vs. a reference that mirrors the kernel's bf16-operand / f32-accum math.
    ref = reference_forward_bf16(x, w1, b1, w2, b2)
    err = float(jnp.max(jnp.abs(out - ref)))
    assert jnp.allclose(out, ref, atol=1e-3, rtol=1e-3), err

    # Loose sanity check vs. the true f32 PyTorch-equivalent forward (bf16 operand rounding
    # gives ~1e-3 absolute deviation at these magnitudes).
    ref32 = reference_forward_f32(x, w1, b1, w2, b2)
    err32 = float(jnp.max(jnp.abs(out - ref32)))
    assert jnp.allclose(out, ref32, atol=5e-2, rtol=5e-2), err32

    print("KERNEL_OK")
</pallas_src>

<mosaic_0001>
module attributes {stable_mosaic.version = 11 : i64} {
  func.func @mlp_kernel(%arg0: i32, %arg1: memref<8x20xf32, #tpu.memory_space<vmem>>, %arg2: memref<20x128xbf16, #tpu.memory_space<vmem>>, %arg3: memref<1x128xf32, #tpu.memory_space<vmem>>, %arg4: memref<128x8xbf16, #tpu.memory_space<vmem>>, %arg5: memref<1x8xf32, #tpu.memory_space<vmem>>, %arg6: memref<8x8xf32, #tpu.memory_space<vmem>>) attributes {dimension_semantics = [#tpu.dimension_semantics<parallel>], iteration_bounds = array<i64: 1>, scalar_prefetch = 0 : i64, scratch_operands = 0 : i64, tpu.core_type = #tpu.core_type<tc>, window_params = [{transform_indices = @transform_0, window_bounds = array<i64: 8, 20>}, {pipeline_mode = #tpu.pipeline_mode<synchronous>, transform_indices = @transform_1, window_bounds = array<i64: 20, 128>}, {pipeline_mode = #tpu.pipeline_mode<synchronous>, transform_indices = @transform_2, window_bounds = array<i64: 1, 128>}, {pipeline_mode = #tpu.pipeline_mode<synchronous>, transform_indices = @transform_3, window_bounds = array<i64: 128, 8>}, {pipeline_mode = #tpu.pipeline_mode<synchronous>, transform_indices = @transform_4, window_bounds = array<i64: 1, 8>}, {transform_indices = @transform_5, window_bounds = array<i64: 8, 8>}]} {
    %c0 = arith.constant 0 : index
    %c0_0 = arith.constant 0 : index
    %0 = vector.load %arg1[%c0, %c0_0] : memref<8x20xf32, #tpu.memory_space<vmem>>, vector<8x20xf32>
    %1 = arith.truncf %0 : vector<8x20xf32> to vector<8x20xbf16>
    %c0_1 = arith.constant 0 : index
    %c0_2 = arith.constant 0 : index
    %2 = vector.load %arg2[%c0_1, %c0_2] : memref<20x128xbf16, #tpu.memory_space<vmem>>, vector<20x128xbf16>
    %cst = arith.constant dense<0.000000e+00> : vector<8x128xf32>
    %3 = tpu.matmul %1, %2, %cst {dimension_numbers = #tpu.dot_dimension_numbers<[1], [0], [0], [1], [0, 0, 1, 1], [], []>} : vector<8x20xbf16>, vector<20x128xbf16>, vector<8x128xf32> -> vector<8x128xf32>
    %c0_3 = arith.constant 0 : index
    %c0_4 = arith.constant 0 : index
    %4 = vector.load %arg3[%c0_3, %c0_4] : memref<1x128xf32, #tpu.memory_space<vmem>>, vector<1x128xf32>
    %5 = vector.broadcast %4 : vector<1x128xf32> to vector<8x128xf32>
    %6 = arith.addf %3, %5 : vector<8x128xf32>
    %cst_5 = arith.constant 0.000000e+00 : f32
    %7 = vector.broadcast %cst_5 : f32 to vector<8x128xf32>
    %8 = arith.maximumf %6, %7 : vector<8x128xf32>
    %9 = arith.truncf %8 : vector<8x128xf32> to vector<8x128xbf16>
    %c0_6 = arith.constant 0 : index
    %c0_7 = arith.constant 0 : index
    %10 = vector.load %arg4[%c0_6, %c0_7] : memref<128x8xbf16, #tpu.memory_space<vmem>>, vector<128x8xbf16>
    %cst_8 = arith.constant dense<0.000000e+00> : vector<8x8xf32>
    %11 = tpu.matmul %9, %10, %cst_8 {dimension_numbers = #tpu.dot_dimension_numbers<[1], [0], [0], [1], [0, 0, 1, 1], [], []>} : vector<8x128xbf16>, vector<128x8xbf16>, vector<8x8xf32> -> vector<8x8xf32>
    %c0_9 = arith.constant 0 : index
    %c0_10 = arith.constant 0 : index
    %12 = vector.load %arg5[%c0_9, %c0_10] : memref<1x8xf32, #tpu.memory_space<vmem>>, vector<1x8xf32>
    %13 = vector.broadcast %12 : vector<1x8xf32> to vector<8x8xf32>
    %14 = arith.addf %11, %13 : vector<8x8xf32>
    %c0_11 = arith.constant 0 : index
    %c0_12 = arith.constant 0 : index
    %15 = vector.load %arg6[%c0_11, %c0_12] : memref<8x8xf32, #tpu.memory_space<vmem>>, vector<8x8xf32>
    tpu.vector_store %arg6[%c0_11, %c0_12], %14 {strides = array<i32>} : memref<8x8xf32, #tpu.memory_space<vmem>>, vector<8x8xf32>,
    return
  }
  func.func @transform_0(%arg0: i32) -> (i32, i32) {
    %c0_i32 = arith.constant 0 : i32
    %c0_i32_0 = arith.constant 0 : i32
    return %arg0, %c0_i32 : i32, i32
  }
  func.func @transform_1(%arg0: i32) -> (i32, i32) {
    %c0_i32 = arith.constant 0 : i32
    %c0_i32_0 = arith.constant 0 : i32
    %c0_i32_1 = arith.constant 0 : i32
    return %c0_i32, %c0_i32_0 : i32, i32
  }
  func.func @transform_2(%arg0: i32) -> (i32, i32) {
    %c0_i32 = arith.constant 0 : i32
    %c0_i32_0 = arith.constant 0 : i32
    %c0_i32_1 = arith.constant 0 : i32
    return %c0_i32, %c0_i32_0 : i32, i32
  }
  func.func @transform_3(%arg0: i32) -> (i32, i32) {
    %c0_i32 = arith.constant 0 : i32
    %c0_i32_0 = arith.constant 0 : i32
    %c0_i32_1 = arith.constant 0 : i32
    return %c0_i32, %c0_i32_0 : i32, i32
  }
  func.func @transform_4(%arg0: i32) -> (i32, i32) {
    %c0_i32 = arith.constant 0 : i32
    %c0_i32_0 = arith.constant 0 : i32
    %c0_i32_1 = arith.constant 0 : i32
    return %c0_i32, %c0_i32_0 : i32, i32
  }
  func.func @transform_5(%arg0: i32) -> (i32, i32) {
    %c0_i32 = arith.constant 0 : i32
    %c0_i32_0 = arith.constant 0 : i32
    return %arg0, %c0_i32 : i32, i32
  }
}

</mosaic_0001>

<bundles_post_ra>
// kernel: neural_network_forward.1
= control target key start
LH: loop header
LB: loop body
LE: loop exit
PB: predicated region body
PF: predicated region fallthrough
CT: control target
= control target key end

     0   :  { %v310_v1 = vmov 0.0   ;;  %vm47_vm0 = vcmask 1041408   ;;  %vm311_vm1 = vmmov 0   ;;  %vm43_vm2 = vcmask 162816   ;;  %s394_s0 = inlined_call_operand.vmem [shape: f32[8,20], index: 0, kind: input, shape index: {}]   ;;  %s395_s1 = inlined_call_operand.vmem [shape: bf16[20,128], index: 1, kind: input, shape index: {}]   ;;  %s396_s2 = inlined_call_operand.vmem [shape: f32[1,128], index: 2, kind: input, shape index: {}]   ;;  %s397_s3 = inlined_call_operand.vmem [shape: bf16[128,8], index: 3, kind: input, shape index: {}]   ;;  %s398_s4 = inlined_call_operand.vmem [shape: f32[1,8], index: 4, kind: input, shape index: {}]   ;;  %s399_s5 = inlined_call_operand.hbm [shape: f32[8,8], index: 5, kind: output, shape index: {}]  }
   0x1   :  { %v276_v0 = vld [vmem:[%s395_s1] sm:$0xff]   ;;  %245 = vmatprep.subr.bf16.mxu0 %v310_v1  ;;  %v277_v2 = vld [vmem:[%s395_s1 + $0x8] ss:$0 sps:$4 sm:$0x33]   ;;  %253 = vmatprep.subr.bf16.mxu1 %v310_v1  ;;  %v280_v8 = vld [vmem:[%s397_s3 + $0x10] sm:$0xff]  }
   0x2   :  { %246 = vmatpush3.bf16.msra.mxu0 %v276_v0  ;;  %v22_v3 = vld [vmem:[%s394_s0] sm:$0xff]  ;;  %v49_v5 = vsel %vm47_vm0, %v277_v2, 0  ;;  %249 = vmatprep.mubr.msk.bf16.mxu0 %vm311_vm1, %v310_v1  ;;  %v279_v6 = vld [vmem:[%s397_s3 + $0x8] sm:$0xff]  }
   0x3   :  { %v278_v4 = vld [vmem:[%s397_s3] sm:$0xff]   ;;  %247 = vmatprep.subr.bf16.mxu0 %v310_v1  ;;  %269 = vmatprep.mubr.msk.bf16.mxu1 %vm311_vm1, %v310_v1  ;;  %v23_v7 = vpack.c.bf16 %v22_v3, %v22_v3 }
   0x4   :  { %254 = vmatpush3.bf16.msra.mxu1 %v278_v4 }
   0x5   :  { %255 = vmatprep.subr.bf16.mxu1 %v310_v1 }
   0x6   :  { %248 = vmatpush3.bf16.msra.mxu0 %v49_v5 }
   0x8   :  { %256 = vmatpush3.bf16.msra.mxu1 %v279_v6 }
   0x9   :  { %250 = vmatmul.mubr.msk.bf16.vlgmr.msra.gmra.mrb[0].mxu0 %vm43_vm2, %v23_v7  ;;  %257 = vmatprep.subr.bf16.mxu1 %v310_v1 }
   0xa   :  { %10 = vsyncpa [#allocation3], 0  ;;  %v281_v9 = vld [vmem:[%s397_s3 + $0x18] sm:$0xff]   ;;  %v282_v10 = vld [vmem:[%s397_s3 + $0x20] sm:$0xff]   ;;  %s312_s17 = smov [#allocation2]   ;;  %vm204_vm3 = vcmask 64512  }
   0xb   :  { %v283_v11 = vld [vmem:[%s397_s3 + $0x28] sm:$0xff]   ;;  %v284_v12 = vld [vmem:[%s397_s3 + $0x30] sm:$0xff]   ;;  %v285_v13 = vld [vmem:[%s397_s3 + $0x38] sm:$0xff]   ;;  %s212_s18 = sshll.u32 %s312_s17, 4  ;;  %s213_s18 = int_to_ptr.vmem [resolvable:$true] %s212_s18 }
   0xc   :  { %258 = vmatpush3.bf16.msra.mxu1 %v280_v8  ;;  %v220_v14 = vld [vmem:[%s396_s2] ss:$0 sm:$0xff]  ;;  %s286_s2 = scalar_lea.vmem %s213_s18, 128  ;;  %p291_p1 = scmp.lt.s32.totalorder %s213_s18, %s213_s18 }
   0xd   :  { %259 = vmatprep.subr.bf16.mxu1 %v310_v1  ;;  %v224_v22 = vld [vmem:[%s398_s4] ss:$0 sm:$0xff]  ;;  %p287_p0 = scmp.ne.s32.totalorder %s213_s18, %s286_s2  ;;  %p292_p2 = scmp.lt.s32.totalorder %s286_s2, %s286_s2 }
   0xf   :  { %p293_p3 = por %p292_p2, %p291_p1 }
  0x10   :  { %260 = vmatpush3.bf16.msra.mxu1 %v281_v9 }
  0x11   :  { %261 = vmatprep.subr.bf16.mxu1 %v310_v1  ;;  %p294_p4 = pnand %p293_p3, %p287_p0 }
  0x14   :  { %262 = vmatpush3.bf16.msra.mxu1 %v282_v10 }
  0x15   :  { %263 = vmatprep.subr.bf16.mxu1 %v310_v1 }
  0x18   :  { %264 = vmatpush3.bf16.msra.mxu1 %v283_v11 }
  0x19   :  { %265 = vmatprep.subr.bf16.mxu1 %v310_v1 }
  0x1c   :  { %266 = vmatpush3.bf16.msra.mxu1 %v284_v12 }
  0x1d   :  { %267 = vmatprep.subr.bf16.mxu1 %v310_v1 }
  0x20   :  { %268 = vmatpush3.bf16.msra.mxu1 %v285_v13 }
  0xdc   :  { %v85_v15 = vpop.f32.mrb[0].mxu0 }
  0xdd   :  { %v86_v16 = vadd.f32 %v220_v14, %v85_v15  ;;  %v251_v17 = vpop.f32.mrb[1].mxu0 }
  0xde   :  { %v88_v18 = vpop.f32.mrb[2].mxu0 }
  0xdf   :  { %v91_v19 = vmax.f32 %v86_v16, 0.0  ;;  %v252_v20 = vpop.f32.mrb[3].mxu0 }
  0xe1   :  { %v92_v21 = vpack.c.bf16 %v91_v19, %v91_v19 }
  0xe3   :  { %270 = vmatmul.mubr.bf16.vlgmr.msra.gmra.mrb[0].mxu1 %v92_v21 }
 0x1b6   :  { %v198_v23 = vpop.f32.mrb[0].mxu1 }
 0x1b7   :  { %v199_v24 = vadd.f32 %v224_v22, %v198_v23  ;;  %v271_v25 = vpop.f32.mrb[1].mxu1 }
 0x1b8   :  { %v201_v26 = vpop.f32.mrb[2].mxu1 }
 0x1b9   :  { %v272_v27 = vpop.f32.mrb[3].mxu1  ;;  %205 = vst.msk [vmem:[#allocation2] sm:$0xff] %vm204_vm3, %v199_v24 }
 0x1ba   :  { %297 = shalt.err (!%p294_p4)
}
 0x1bb   :  { %s298_s4 = scalar_lea.hbm %s399_s5, 128 }
 0x1bc   :  { %p299_p5 = scmp.ne.s32.totalorder %s399_s5, %s298_s4  ;;  %p302_p6 = scmp.lt.u32.totalorder %s298_s4, %s399_s5 }
 0x1be   :  { %p304_p7 = pnand %p302_p6, %p299_p5 }
 0x1c0   :  { %307 = shalt.err (!%p304_p7)
}
 0x1c1   :  { %215 = dma.vmem_to_hbm [thread:$0]  %s213_s18, 128, %s399_s5, [#allocation3]  }
 0x1c2   :  { %308 = dma.done.wait [#allocation3], 128  }
 0x1c3   :  { %309 = vsyncadd [#allocation3], 4294967168 }
 0x1c4   :  { %219 = vsyncpa [#allocation3], 1 }

</bundles_post_ra>
